<compile_context>
chip_gen: v7x
topology: tpu7x:2x2x1
jax: 0.10.0
libtpu: 0.0.40
codegen_flags: <defaults>
</compile_context>

<pallas_src>
import functools

import jax
import jax.numpy as jnp
from jax.experimental import pallas as pl
from jax.experimental.pallas import tpu as pltpu

_LANE = 128         # lane-dense padding for weights / biases / output
_BATCH_TILE = 128   # batch tile for the gridded (large-B) path


def _round_up(x, m):
    return ((x + m - 1) // m) * m


def _dqn_kernel(x_ref, w_ref, b_ref, out_ref, *, num_layers, is_dueling,
                action_size, state_size):
    """Fused MLP forward.

    x_ref:   [B, S]      f32  raw (un-padded) input features
    w_ref:   [L, D, D]   bf16 per-layer [in, out] weights, zero-padded to D=128
    b_ref:   [L, 1, D]   f32  per-layer biases, zero-padded
    out_ref: [B, D]      f32  lane-dense output slab; caller keeps [:, :A]
    """
    # Layer 0: cast raw x to bf16 in-kernel, matmul against the static row slice
    # of the padded weight (state_size is a compile-time constant -> free slice).
    x = x_ref[...].astype(jnp.bfloat16)
    y = (jnp.dot(x, w_ref[0, :state_size, :], preferred_element_type=jnp.float32)
         + b_ref[0])

    # Remaining layers: ReLU on the previous (front) layer, then Linear.
    # Layers 0 .. L-2 are front layers (followed by ReLU); layer L-1 is the head.
    for i in range(1, num_layers):
        h = jnp.maximum(y, 0.0).astype(jnp.bfloat16)
        y = jnp.dot(h, w_ref[i], preferred_element_type=jnp.float32) + b_ref[i]

    if is_dueling:
        # Head columns are packed [advantage(0..A-1) | value(A)].
        v = y[:, action_size:action_size + 1]
        # Reference math: v + (a - a/A)  ==  v + (1 - 1/A) * a
        # Applied to the whole lane-dense slab; only columns < A are meaningful.
        out = v + (1.0 - 1.0 / action_size) * y
    else:
        out = y

    out_ref[...] = out.astype(out_ref.dtype)


def pack_params(params, state_size, network_layers, action_size, is_dueling):
    """Pack flat [w1,b1,w2,b2,...] params into one weight slab + one bias slab.

    Weights are stored [in, out]. The dueling advantage/value heads are fused
    into one [hidden, A+1] weight with ADVANTAGE FIRST (columns 0..A-1) and the
    value in column A, so the kernel's output slab is lane-aligned with the
    final Q-values. Everything is zero-padded to a square lane-dense dim D=128.
    """
    dims = [state_size] + list(network_layers)
    num_front = len(dims) - 1

    w_list, b_list = [], []
    idx = 0
    for _ in range(num_front):
        w_list.append(params[idx])
        b_list.append(params[idx + 1])
        idx += 2

    if is_dueling:
        w_v, b_v, w_a, b_a = params[idx], params[idx + 1], params[idx + 2], params[idx + 3]
        w_list.append(jnp.concatenate([w_a, w_v], axis=1))   # [hidden, A+1], adv first
        b_list.append(jnp.concatenate([b_a, b_v], axis=0))   # [A+1]
        head_out = action_size + 1
    else:
        w_list.append(params[idx])
        b_list.append(params[idx + 1])
        head_out = action_size

    max_dim = _round_up(max(dims + [head_out]), _LANE)
    num_layers = len(w_list)

    w_slab = jnp.zeros((num_layers, max_dim, max_dim), jnp.float32)
    b_slab = jnp.zeros((num_layers, 1, max_dim), jnp.float32)
    for i, (w, b) in enumerate(zip(w_list, b_list)):
        w_slab = w_slab.at[i, :w.shape[0], :w.shape[1]].set(w)
        b_slab = b_slab.at[i, 0, :b.shape[0]].set(b)

    return w_slab.astype(jnp.bfloat16), b_slab, num_layers, max_dim


def dqn_forward(x, w_slab, b_slab, *, num_layers, is_dueling, action_size,
                state_size, max_dim):
    """x: [B, state_size] f32 (raw). Returns [B, action_size] f32."""
    batch = x.shape[0]

    kernel = functools.partial(
        _dqn_kernel,
        num_layers=num_layers,
        is_dueling=is_dueling,
        action_size=action_size,
        state_size=state_size,
    )
    out_shape = jax.ShapeDtypeStruct((batch, max_dim), jnp.float32)

    use_grid = (batch >= 256) and (batch % _BATCH_TILE == 0)
    if use_grid:
        # Training-size batches: parallel batch grid -> both v7x TensorCores.
        out = pl.pallas_call(
            kernel,
            out_shape=out_shape,
            grid=(batch // _BATCH_TILE,),
            in_specs=[
                pl.BlockSpec((_BATCH_TILE, state_size), lambda i: (i, 0)),
                pl.BlockSpec((num_layers, max_dim, max_dim), lambda i: (0, 0, 0)),
                pl.BlockSpec((num_layers, 1, max_dim), lambda i: (0, 0, 0)),
            ],
            out_specs=pl.BlockSpec((_BATCH_TILE, max_dim), lambda i: (i, 0)),
            compiler_params=pltpu.CompilerParams(
                dimension_semantics=("parallel",)),
        )(x, w_slab, b_slab)
    else:
        # Inference-size batches: grid-less, everything resident in VMEM.
        vmem = pl.BlockSpec(memory_space=pltpu.MemorySpace.VMEM)
        out = pl.pallas_call(
            kernel,
            out_shape=out_shape,
            in_specs=[vmem, vmem, vmem],
            out_specs=vmem,
        )(x, w_slab, b_slab)

    # Lane-dense kernel output; keep only the real action columns.
    return out[:, :action_size]


def init_params(key, state_size, network_layers, action_size, is_dueling):
    """Deterministic PyTorch-Linear-style init; weights stored as [in, out]."""
    dims = [state_size] + list(network_layers)
    params = []
    for i in range(len(dims) - 1):
        fan_in, fan_out = dims[i], dims[i + 1]
        key, kw, kb = jax.random.split(key, 3)
        bound = 1.0 / jnp.sqrt(fan_in)
        params.append(jax.random.uniform(kw, (fan_in, fan_out), jnp.float32, -bound, bound))
        params.append(jax.random.uniform(kb, (fan_out,), jnp.float32, -bound, bound))
    hidden = dims[-1]
    head_outs = ([1, action_size] if is_dueling else [action_size])
    for out_dim in head_outs:
        key, kw, kb = jax.random.split(key, 3)
        bound = 1.0 / jnp.sqrt(hidden)
        params.append(jax.random.uniform(kw, (hidden, out_dim), jnp.float32, -bound, bound))
        params.append(jax.random.uniform(kb, (out_dim,), jnp.float32, -bound, bound))
    return params


def dqn_forward_ref(x, params, *, is_dueling, action_size):
    """Pure-JAX reference mirroring the PyTorch forward.

    Matches the kernel's bf16 quantization of weights/activations (f32 math,
    f32 biases) so it is comparable at tight tolerance.
    """
    def q(v):
        return v.astype(jnp.bfloat16).astype(jnp.float32)

    num_front = (len(params) - (4 if is_dueling else 2)) // 2
    h = q(x)
    idx = 0
    for _ in range(num_front):
        h = jnp.maximum(h @ q(params[idx]) + params[idx + 1], 0.0)
        h = q(h)
        idx += 2
    if is_dueling:
        v = h @ q(params[idx]) + params[idx + 1]
        a = h @ q(params[idx + 2]) + params[idx + 3]
        return v + (a - (1.0 / action_size) * a)
    return h @ q(params[idx]) + params[idx + 1]


def _run_case(key, *, batch, state_size, network_layers, action_size, is_dueling):
    key, kx = jax.random.split(key)
    x = jax.random.normal(kx, (batch, state_size), jnp.float32)
    params = init_params(key, state_size, network_layers, action_size, is_dueling)
    w_slab, b_slab, num_layers, max_dim = pack_params(
        params, state_size, network_layers, action_size, is_dueling)

    out = dqn_forward(x, w_slab, b_slab, num_layers=num_layers,
                      is_dueling=is_dueling, action_size=action_size,
                      state_size=state_size, max_dim=max_dim)
    out = jax.block_until_ready(out)

    ref = dqn_forward_ref(x, params, is_dueling=is_dueling, action_size=action_size)
    assert out.shape == (batch, action_size)
    assert jnp.allclose(out, ref, atol=1e-3, rtol=1e-3), \
        f"mismatch vs JAX reference (dueling={is_dueling}, batch={batch})"


if __name__ == "__main__":
    # Small, module-consistent shapes: state=32, hidden=[64, 64], actions=4.
    cfg = dict(state_size=32, network_layers=[64, 64], action_size=4)
    key = jax.random.PRNGKey(0)
    k1, k2, k3 = jax.random.split(key, 3)

    _run_case(k1, batch=8, is_dueling=True, **cfg)     # grid-less path
    _run_case(k2, batch=8, is_dueling=False, **cfg)    # grid-less path
    _run_case(k3, batch=256, is_dueling=True, **cfg)   # parallel batch-grid path

    print("KERNEL_OK")
</pallas_src>

<mosaic_0001>
module attributes {stable_mosaic.version = 11 : i64} {
  func.func @_dqn_kernel(%arg0: memref<8x32xf32, #tpu.memory_space<vmem>>, %arg1: memref<3x128x128xbf16, #tpu.memory_space<vmem>>, %arg2: memref<3x1x128xf32, #tpu.memory_space<vmem>>, %arg3: memref<8x128xf32, #tpu.memory_space<vmem>>) attributes {dimension_semantics = [], scalar_prefetch = 0 : i64, scratch_operands = 0 : i64, tpu.core_type = #tpu.core_type<tc>} {
    %c0 = arith.constant 0 : index
    %c0_0 = arith.constant 0 : index
    %0 = vector.load %arg0[%c0, %c0_0] : memref<8x32xf32, #tpu.memory_space<vmem>>, vector<8x32xf32>
    %1 = arith.truncf %0 : vector<8x32xf32> to vector<8x32xbf16>
    %c0_1 = arith.constant 0 : index
    %c0_2 = arith.constant 0 : index
    %c0_3 = arith.constant 0 : index
    %2 = vector.load %arg1[%c0_1, %c0_2, %c0_3] : memref<3x128x128xbf16, #tpu.memory_space<vmem>>, vector<1x32x128xbf16>
    %3 = vector.shape_cast %2 : vector<1x32x128xbf16> to vector<32x128xbf16>
    %cst = arith.constant dense<0.000000e+00> : vector<8x128xf32>
    %4 = tpu.matmul %1, %3, %cst {dimension_numbers = #tpu.dot_dimension_numbers<[1], [0], [0], [1], [0, 0, 1, 1], [], []>} : vector<8x32xbf16>, vector<32x128xbf16>, vector<8x128xf32> -> vector<8x128xf32>
    %c0_4 = arith.constant 0 : index
    %c0_5 = arith.constant 0 : index
    %c0_6 = arith.constant 0 : index
    %5 = vector.load %arg2[%c0_4, %c0_5, %c0_6] : memref<3x1x128xf32, #tpu.memory_space<vmem>>, vector<1x1x128xf32>
    %6 = vector.shape_cast %5 : vector<1x1x128xf32> to vector<1x128xf32>
    %7 = vector.broadcast %6 : vector<1x128xf32> to vector<8x128xf32>
    %8 = arith.addf %4, %7 : vector<8x128xf32>
    %cst_7 = arith.constant 0.000000e+00 : f32
    %9 = vector.broadcast %cst_7 : f32 to vector<8x128xf32>
    %10 = arith.maximumf %8, %9 : vector<8x128xf32>
    %11 = arith.truncf %10 : vector<8x128xf32> to vector<8x128xbf16>
    %c1 = arith.constant 1 : index
    %c0_8 = arith.constant 0 : index
    %c0_9 = arith.constant 0 : index
    %12 = vector.load %arg1[%c1, %c0_8, %c0_9] : memref<3x128x128xbf16, #tpu.memory_space<vmem>>, vector<1x128x128xbf16>
    %13 = vector.shape_cast %12 : vector<1x128x128xbf16> to vector<128x128xbf16>
    %cst_10 = arith.constant dense<0.000000e+00> : vector<8x128xf32>
    %14 = tpu.matmul %11, %13, %cst_10 {dimension_numbers = #tpu.dot_dimension_numbers<[1], [0], [0], [1], [0, 0, 1, 1], [], []>} : vector<8x128xbf16>, vector<128x128xbf16>, vector<8x128xf32> -> vector<8x128xf32>
    %c1_11 = arith.constant 1 : index
    %c0_12 = arith.constant 0 : index
    %c0_13 = arith.constant 0 : index
    %15 = vector.load %arg2[%c1_11, %c0_12, %c0_13] : memref<3x1x128xf32, #tpu.memory_space<vmem>>, vector<1x1x128xf32>
    %16 = vector.shape_cast %15 : vector<1x1x128xf32> to vector<1x128xf32>
    %17 = vector.broadcast %16 : vector<1x128xf32> to vector<8x128xf32>
    %18 = arith.addf %14, %17 : vector<8x128xf32>
    %cst_14 = arith.constant 0.000000e+00 : f32
    %19 = vector.broadcast %cst_14 : f32 to vector<8x128xf32>
    %20 = arith.maximumf %18, %19 : vector<8x128xf32>
    %21 = arith.truncf %20 : vector<8x128xf32> to vector<8x128xbf16>
    %c2 = arith.constant 2 : index
    %c0_15 = arith.constant 0 : index
    %c0_16 = arith.constant 0 : index
    %22 = vector.load %arg1[%c2, %c0_15, %c0_16] : memref<3x128x128xbf16, #tpu.memory_space<vmem>>, vector<1x128x128xbf16>
    %23 = vector.shape_cast %22 : vector<1x128x128xbf16> to vector<128x128xbf16>
    %cst_17 = arith.constant dense<0.000000e+00> : vector<8x128xf32>
    %24 = tpu.matmul %21, %23, %cst_17 {dimension_numbers = #tpu.dot_dimension_numbers<[1], [0], [0], [1], [0, 0, 1, 1], [], []>} : vector<8x128xbf16>, vector<128x128xbf16>, vector<8x128xf32> -> vector<8x128xf32>
    %c2_18 = arith.constant 2 : index
    %c0_19 = arith.constant 0 : index
    %c0_20 = arith.constant 0 : index
    %25 = vector.load %arg2[%c2_18, %c0_19, %c0_20] : memref<3x1x128xf32, #tpu.memory_space<vmem>>, vector<1x1x128xf32>
    %26 = vector.shape_cast %25 : vector<1x1x128xf32> to vector<1x128xf32>
    %27 = vector.broadcast %26 : vector<1x128xf32> to vector<8x128xf32>
    %28 = arith.addf %24, %27 : vector<8x128xf32>
    %29 = vector.extract_strided_slice %28 {offsets = [0, 4], sizes = [8, 1], strides = [1, 1]} : vector<8x128xf32> to vector<8x1xf32>
    %cst_21 = arith.constant 7.500000e-01 : f32
    %30 = vector.broadcast %cst_21 : f32 to vector<8x128xf32>
    %31 = arith.mulf %30, %28 : vector<8x128xf32>
    %32 = vector.broadcast %29 : vector<8x1xf32> to vector<8x128xf32>
    %33 = arith.addf %32, %31 : vector<8x128xf32>
    %c0_22 = arith.constant 0 : index
    %c0_23 = arith.constant 0 : index
    %34 = vector.load %arg3[%c0_22, %c0_23] : memref<8x128xf32, #tpu.memory_space<vmem>>, vector<8x128xf32>
    tpu.vector_store %arg3[%c0_22, %c0_23], %33 {strides = array<i32>} : memref<8x128xf32, #tpu.memory_space<vmem>>, vector<8x128xf32>,
    return
  }
}

</mosaic_0001>

<bundles_post_ra>
// kernel: tpu_custom_call.1
= control target key start
LH: loop header
LB: loop body
LE: loop exit
PB: predicated region body
PF: predicated region fallthrough
CT: control target
= control target key end

     0   :  { %8 = vsyncpa [#allocation3], 0  ;;  %s661_s0 = inlined_call_operand.hbm [shape: f32[8,32], index: 0, kind: input, shape index: {}]   ;;  %s662_s1 = inlined_call_operand.hbm [shape: bf16[3,128,128], index: 1, kind: input, shape index: {}]   ;;  %s663_s2 = inlined_call_operand.vmem [shape: f32[3,1,128], index: 2, kind: input, shape index: {}]   ;;  %s664_s3 = inlined_call_operand.hbm [shape: f32[8,128], index: 3, kind: output, shape index: {}]  }
   0x1   :  { %9 = vsyncpa [#allocation6], 0 }
   0x2   :  { %10 = vsyncpa [#allocation4], 0  ;;  %s557_s12 = smov [#allocation2]   ;;  %s558_s14 = smov [#allocation5]  }
   0x3   :  { %s17_s13 = sshll.u32 %s557_s12, 4  ;;  %s26_s15 = sshll.u32 %s558_s14, 4  ;;  %s18_s13 = int_to_ptr.vmem [resolvable:$true] %s17_s13  ;;  %s585_s15 = int_to_ptr.vmem [resolvable:$true] %s26_s15 }
   0x4   :  { %s485_s18 = scalar_lea.hbm %s661_s0, 128 }
   0x5   :  { %p486_p0 = scmp.ne.s32.totalorder %s661_s0, %s485_s18  ;;  %p489_p1 = scmp.lt.u32.totalorder %s485_s18, %s661_s0 }
   0x7   :  { %p491_p2 = pnand %p489_p1, %p486_p0 }
   0x9   :  { %494 = shalt.err (!%p491_p2)
}
   0xa   :  { %s495_s23 = scalar_lea.vmem %s18_s13, 128  ;;  %p500_p4 = scmp.lt.s32.totalorder %s18_s13, %s18_s13 }
   0xb   :  { %p496_p3 = scmp.ne.s32.totalorder %s18_s13, %s495_s23  ;;  %p501_p5 = scmp.lt.s32.totalorder %s495_s23, %s495_s23 }
   0xd   :  { %p502_p6 = por %p501_p5, %p500_p4 }
   0xf   :  { %p503_p7 = pnand %p502_p6, %p496_p3 }
  0x11   :  { %506 = shalt.err (!%p503_p7)
}
  0x12   :  { %20 = dma.hbm_to_vmem [thread:$0]  %s661_s0, 128, %s18_s13, [#allocation3]  }
  0x13   :  { %s507_s28 = scalar_lea.hbm %s662_s1, 3072 }
  0x14   :  { %p508_p8 = scmp.ne.s32.totalorder %s662_s1, %s507_s28  ;;  %p511_p9 = scmp.lt.u32.totalorder %s507_s28, %s662_s1 }
  0x16   :  { %p513_p10 = pnand %p511_p9, %p508_p8 }
  0x18   :  { %516 = shalt.err (!%p513_p10)
}
  0x19   :  { %s517_s6 = scalar_lea.vmem %s585_s15, 3072  ;;  %p522_p12 = scmp.lt.s32.totalorder %s585_s15, %s585_s15 }
  0x1a   :  { %p518_p11 = scmp.ne.s32.totalorder %s585_s15, %s517_s6  ;;  %p523_p13 = scmp.lt.s32.totalorder %s517_s6, %s517_s6 }
  0x1c   :  { %p524_p0 = por %p523_p13, %p522_p12 }
  0x1e   :  { %p525_p1 = pnand %p524_p0, %p518_p11 }
  0x20   :  { %528 = shalt.err (!%p525_p1)
}
  0x21   :  { %s559_s0 = smov 64   ;;  %s560_s7 = smov 4  }
  0x22   :  { %32 = dma.hbm_to_vmem [thread:$0]  %s662_s1, 3072, %s585_s15, [#allocation6], %s559_s0, %s559_s0, %s560_s7  }
  0x23   :  { %551 = dma.done.wait [#allocation3], 128  }
  0x24   :  { %552 = vsyncadd [#allocation3], 4294967168 }
  0x25   :  { %553 = dma.done.wait [#allocation6], 3072  }
  0x26   :  { %554 = vsyncadd [#allocation6], 4294964224  ;;  %v561_v0 = vmov 0.0   ;;  %vm562_vm0 = vmmov 0   ;;  %v467_v1 = vld [vmem:[#allocation5] sm:$0xff]   ;;  %v468_v2 = vld [vmem:[#allocation5 + $0x8] sm:$0xff]  }
  0x27   :  { %410 = vmatprep.subr.bf16.mxu0 %v561_v0  ;;  %414 = vmatprep.mubr.msk.bf16.mxu0 %vm562_vm0, %v561_v0  ;;  %v42_v3 = vld [vmem:[#allocation2] sm:$0xff]  ;;  %v469_v4 = vld [vmem:[#allocation5 + $0x40] sm:$0xff]   ;;  %v470_v6 = vld [vmem:[#allocation5 + $0x48] sm:$0xff]   ;;  %vm67_vm1 = vcmask 261120   ;;  %v563_v37 = vmov 4   ;;  %s564_s15 = smov [#allocation7]  }
  0x28   :  { %418 = vmatprep.subr.bf16.mxu1 %v561_v0  ;;  %434 = vmatprep.mubr.msk.bf16.mxu1 %vm562_vm0, %v561_v0  ;;  %v43_v5 = vpack.c.bf16 %v42_v3, %v42_v3  ;;  %v471_v7 = vld [vmem:[#allocation5 + $0x50] sm:$0xff]   ;;  %v472_v8 = vld [vmem:[#allocation5 + $0x58] sm:$0xff]   ;;  %v473_v9 = vld [vmem:[#allocation5 + $0x60] sm:$0xff]   ;;  %s355_s16 = sshll.u32 %s564_s15, 4  ;;  %s356_s16 = int_to_ptr.vmem [resolvable:$true] %s355_s16 }
  0x29   :  { %411 = vmatpush3.bf16.msra.mxu0 %v467_v1  ;;  %419 = vmatpush3.bf16.msra.mxu1 %v469_v4  ;;  %v474_v10 = vld [vmem:[#allocation5 + $0x68] sm:$0xff]   ;;  %v475_v11 = vld [vmem:[#allocation5 + $0x70] sm:$0xff]   ;;  %v476_v12 = vld [vmem:[#allocation5 + $0x78] sm:$0xff]   ;;  %s529_s17 = scalar_lea.vmem %s356_s16, 128  ;;  %p534_p3 = scmp.lt.s32.totalorder %s356_s16, %s356_s16 }
  0x2a   :  { %412 = vmatprep.subr.bf16.mxu0 %v561_v0  ;;  %420 = vmatprep.subr.bf16.mxu1 %v561_v0  ;;  %v477_v13 = vld [vmem:[#allocation5 + $0x80] sm:$0xff]   ;;  %v478_v14 = vld [vmem:[#allocation5 + $0x88] sm:$0xff]   ;;  %v479_v15 = vld [vmem:[#allocation5 + $0x90] sm:$0xff]   ;;  %p530_p2 = scmp.ne.s32.totalorder %s356_s16, %s529_s17  ;;  %p535_p4 = scmp.lt.s32.totalorder %s529_s17, %s529_s17 }
  0x2b   :  { %v480_v16 = vld [vmem:[#allocation5 + $0x98] sm:$0xff]   ;;  %v481_v17 = vld [vmem:[#allocation5 + $0xa0] sm:$0xff]   ;;  %v482_v18 = vld [vmem:[#allocation5 + $0xa8] sm:$0xff]   ;;  %466 = vset.pattern.permute.xlu0 %v563_v37 }
  0x2c   :  { %v365_v19 = vld [vmem:[%s663_s2] ss:$0 sm:$0xff]  ;;  %v483_v27 = vld [vmem:[#allocation5 + $0xb0] sm:$0xff]   ;;  %v370_v29 = vld [vmem:[%s663_s2 + $0x1] ss:$0 sm:$0xff]  ;;  %p536_p5 = por %p535_p4, %p534_p3 }
  0x2d   :  { %413 = vmatpush3.bf16.msra.mxu0 %v468_v2  ;;  %421 = vmatpush3.bf16.msra.mxu1 %v470_v6  ;;  %v484_v28 = vld [vmem:[#allocation5 + $0xb8] sm:$0xff]  }
  0x2e   :  { %438 = vmatprep.subr.bf16.mxu0 %v561_v0  ;;  %422 = vmatprep.subr.bf16.mxu1 %v561_v0  ;;  %v380_v38 = vld [vmem:[%s663_s2 + $0x2] ss:$0 sm:$0xff]  ;;  %p537_p6 = pnand %p536_p5, %p530_p2 }
  0x30   :  { %415 = vmatmul.mubr.msk.bf16.vlgmr.msra.gmra.mrb[0].mxu0 %vm67_vm1, %v43_v5 }
  0x31   :  { %454 = vmatprep.mubr.msk.bf16.mxu0 %vm562_vm0, %v561_v0  ;;  %423 = vmatpush3.bf16.msra.mxu1 %v471_v7 }
  0x32   :  { %424 = vmatprep.subr.bf16.mxu1 %v561_v0  ;;  %439 = vmatpush3.bf16.msra.mxu0 %v477_v13 }
  0x33   :  { %440 = vmatprep.subr.bf16.mxu0 %v561_v0 }
  0x35   :  { %425 = vmatpush3.bf16.msra.mxu1 %v472_v8 }
  0x36   :  { %426 = vmatprep.subr.bf16.mxu1 %v561_v0  ;;  %441 = vmatpush3.bf16.msra.mxu0 %v478_v14 }
  0x37   :  { %442 = vmatprep.subr.bf16.mxu0 %v561_v0 }
  0x39   :  { %427 = vmatpush3.bf16.msra.mxu1 %v473_v9 }
  0x3a   :  { %428 = vmatprep.subr.bf16.mxu1 %v561_v0  ;;  %443 = vmatpush3.bf16.msra.mxu0 %v479_v15 }
  0x3b   :  { %444 = vmatprep.subr.bf16.mxu0 %v561_v0 }
  0x3d   :  { %429 = vmatpush3.bf16.msra.mxu1 %v474_v10 }
  0x3e   :  { %430 = vmatprep.subr.bf16.mxu1 %v561_v0  ;;  %445 = vmatpush3.bf16.msra.mxu0 %v480_v16 }
  0x3f   :  { %446 = vmatprep.subr.bf16.mxu0 %v561_v0 }
  0x41   :  { %431 = vmatpush3.bf16.msra.mxu1 %v475_v11 }
  0x42   :  { %432 = vmatprep.subr.bf16.mxu1 %v561_v0  ;;  %447 = vmatpush3.bf16.msra.mxu0 %v481_v17 }
  0x43   :  { %448 = vmatprep.subr.bf16.mxu0 %v561_v0 }
  0x45   :  { %433 = vmatpush3.bf16.msra.mxu1 %v476_v12 }
  0x46   :  { %449 = vmatpush3.bf16.msra.mxu0 %v482_v18 }
  0x47   :  { %450 = vmatprep.subr.bf16.mxu0 %v561_v0 }
  0x4a   :  { %451 = vmatpush3.bf16.msra.mxu0 %v483_v27 }
  0x4b   :  { %452 = vmatprep.subr.bf16.mxu0 %v561_v0 }
  0x4e   :  { %453 = vmatpush3.bf16.msra.mxu0 %v484_v28 }
 0x103   :  { %v105_v20 = vpop.f32.mrb[0].mxu0 }
 0x104   :  { %v106_v21 = vadd.f32 %v365_v19, %v105_v20  ;;  %v416_v22 = vpop.f32.mrb[1].mxu0 }
 0x105   :  { %v108_v23 = vpop.f32.mrb[2].mxu0 }
 0x106   :  { %v111_v24 = vmax.f32 %v106_v21, 0.0  ;;  %v417_v25 = vpop.f32.mrb[3].mxu0 }
 0x108   :  { %v112_v26 = vpack.c.bf16 %v111_v24, %v111_v24 }
 0x10a   :  { %435 = vmatmul.mubr.bf16.vlgmr.msra.gmra.mrb[0].mxu1 %v112_v26 }
 0x1dd   :  { %v220_v30 = vpop.f32.mrb[0].mxu1 }
 0x1de   :  { %v221_v31 = vadd.f32 %v370_v29, %v220_v30  ;;  %v436_v32 = vpop.f32.mrb[1].mxu1 }
 0x1df   :  { %v223_v33 = vpop.f32.mrb[2].mxu1 }
 0x1e0   :  { %v226_v34 = vmax.f32 %v221_v31, 0.0  ;;  %v437_v35 = vpop.f32.mrb[3].mxu1 }
 0x1e2   :  { %v227_v36 = vpack.c.bf16 %v226_v34, %v226_v34 }
 0x1e4   :  { %455 = vmatmul.mubr.bf16.vlgmr.msra.gmra.mrb[4].mxu0 %v227_v36 }
 0x2b7   :  { %v335_v39 = vpop.f32.mrb[4].mxu0 }
 0x2b8   :  { %v336_v40 = vadd.f32 %v380_v38, %v335_v39  ;;  %v456_v41 = vpop.f32.mrb[5].mxu0 }
 0x2b9   :  { %v338_v42 = vpop.f32.mrb[6].mxu0 }
 0x2ba   :  { %344 = vperm.xlu0 %466, %v336_v40   ;;  %v457_v43 = vpop.f32.mrb[7].mxu0  ;;  %v341_v44 = vmul.f32 0.75, %v336_v40 }
 0x339   :  { %v345_v45 = vpop.permute.xlu0 %344 }
 0x33a   :  { %v347_v46 = vadd.f32 %v345_v45, %v341_v44 }
 0x33c   :  { %348 = vst [vmem:[#allocation7] sm:$0xff] %v347_v46 }
 0x33d   :  { %540 = shalt.err (!%p537_p6)
}
 0x33e   :  { %s541_s19 = scalar_lea.hbm %s664_s3, 128 }
 0x33f   :  { %p542_p7 = scmp.ne.s32.totalorder %s664_s3, %s541_s19  ;;  %p545_p8 = scmp.lt.u32.totalorder %s541_s19, %s664_s3 }
 0x341   :  { %p547_p9 = pnand %p545_p8, %p542_p7 }
 0x343   :  { %550 = shalt.err (!%p547_p9)
}
 0x344   :  { %358 = dma.vmem_to_hbm [thread:$0]  %s356_s16, 128, %s664_s3, [#allocation4]  }
 0x345   :  { %555 = dma.done.wait [#allocation4], 128  }
 0x346   :  { %556 = vsyncadd [#allocation4], 4294967168 }
 0x347   :  { %362 = vsyncpa [#allocation3], 1 }
 0x348   :  { %363 = vsyncpa [#allocation6], 1 }
 0x349   :  { %364 = vsyncpa [#allocation4], 1 }

</bundles_post_ra>
